<compile_context>
chip_gen: v7x
topology: tpu7x:2x2x1
jax: 0.10.0
libtpu: 0.0.40
codegen_flags: <defaults>
</compile_context>

<pallas_src>
import functools

import jax
import jax.numpy as jnp
from jax import lax
from jax.experimental import pallas as pl
from jax.experimental.pallas import tpu as pltpu


def _cnn_block_kernel(lhs_ref, w_ref, pt_ref, p_ref, gamma_ref, beta_ref,
                      alpha_ref, o_ref, *, eps, inv_count):
    """Fused conv + BN(batch stats) + PReLU.

    lhs_ref:   (M, Kp)        H-im2col input, K zero-padded, lane axis = Kp
    w_ref:     (Kp, OW*OC)    stacked Toeplitz weight, lane-dense output cols
    pt_ref:    (OW*OC, OC)    one-hot fold matrix (reduce OW lane groups)
    p_ref:     (OC, OW*OC)    one-hot tile matrix (broadcast back per-channel)
    gamma/beta:(1, OW*OC)     lane-dense BN affine params
    alpha_ref: (1, 1) SMEM    scalar PReLU slope
    o_ref:     (M, OW*OC)     lane-dense output block
    """
    # ---- Conv2d: one lane-dense MXU contraction, f32 accumulate ----
    y = jnp.dot(lhs_ref[...], w_ref[...],
                preferred_element_type=jnp.float32)               # (M, OW*OC)

    # TODO(synk): nn.Dropout2d train-mode stochastic channel masking is not
    # implemented; eval-mode (identity) semantics are used here.

    # ---- BatchNorm2d batch statistics (training mode), one pass ----
    s_row = jnp.sum(y, axis=0, keepdims=True)                     # (1, OW*OC)
    sq_row = jnp.sum(y * y, axis=0, keepdims=True)                # (1, OW*OC)
    stats = jnp.concatenate([s_row, sq_row], axis=0)              # (2, OW*OC)
    # Fold OW lane groups down to per-channel stats via a tiny one-hot matmul
    # (avoids in-kernel lane relayouts).
    stats_oc = jnp.dot(stats, pt_ref[...],
                       preferred_element_type=jnp.float32) * inv_count  # (2, OC)
    mean_oc = stats_oc[0:1, :]
    var_oc = jnp.maximum(stats_oc[1:2, :] - mean_oc * mean_oc, 0.0)
    # Broadcast mean / var back to the lane-dense row layout.
    mv_row = jnp.dot(jnp.concatenate([mean_oc, var_oc], axis=0), p_ref[...],
                     preferred_element_type=jnp.float32)          # (2, OW*OC)
    inv_row = lax.rsqrt(mv_row[1:2, :] + eps)
    scale_row = gamma_ref[...] * inv_row                          # (1, OW*OC)
    shift_row = beta_ref[...] - mv_row[0:1, :] * scale_row

    # ---- Folded BN affine + PReLU epilogue, lane dense (unmasked vst) ----
    z = y * scale_row + shift_row
    alpha = alpha_ref[0, 0]                                       # scalar (SMEM)
    o_ref[...] = jnp.where(z >= 0.0, z, alpha * z).astype(o_ref.dtype)


def cnn_block_forward(x_nchw, w_oihw, bias, gamma, beta, alpha, *,
                      padding=1, eps=1e-5, compute_dtype=None):
    N, C, H, W = x_nchw.shape
    OC, _, KH, KW = w_oihw.shape
    Hp = H + 2 * padding
    Wp = W + 2 * padding
    OH = Hp - KH + 1
    OW = Wp - KW + 1
    M = N * OH
    K = KH * Wp * C
    Kp = ((K + 127) // 128) * 128          # aligned K; 216 -> 256 here
    LANES = OW * OC
    if compute_dtype is None:
        compute_dtype = x_nchw.dtype

    # ---- glue: NCHW -> padded NHWC -> H-direction im2col LHS (M, Kp) ----
    x_nhwc = jnp.transpose(x_nchw, (0, 2, 3, 1))
    x_pad = jnp.pad(x_nhwc, ((0, 0), (padding, padding),
                             (padding, padding), (0, 0)))
    x_m = x_pad.reshape(N, Hp, Wp * C)
    rows = jnp.arange(OH)[:, None] + jnp.arange(KH)[None, :]      # (OH, KH)
    lhs = x_m[:, rows, :].reshape(M, K)                           # (M, KH*Wp*C)
    lhs = jnp.pad(lhs, ((0, 0), (0, Kp - K))).astype(compute_dtype)

    # ---- Toeplitz-structured weight stacked along K: (Kp, OW*OC) ----
    # w_big[kh*Wp*C + j*C + c, ow*OC + oc] = w[oc, c, kh, j-ow] if 0<=j-ow<KW else 0
    # TODO(synk): at realistic sizes (C, OC >= 64, W >= 32) this dense Toeplitz
    # operand outgrows v7x's 64 MiB VMEM; switch to a K-tiled "arbitrary" grid
    # axis (VMEM accumulator) or a true KH*KW*C im2col there.
    w_k = jnp.transpose(w_oihw, (2, 3, 1, 0))                     # (KH, KW, C, OC)
    j = jnp.arange(Wp)[:, None]
    ow = jnp.arange(OW)[None, :]
    tap = j - ow                                                  # (Wp, OW)
    valid = (tap >= 0) & (tap < KW)
    g = w_k[:, jnp.clip(tap, 0, KW - 1), :, :]                    # (KH, Wp, OW, C, OC)
    g = jnp.where(valid[None, :, :, None, None], g, 0.0)
    w_big = jnp.transpose(g, (0, 1, 3, 2, 4)).reshape(K, LANES)
    w_big = jnp.pad(w_big, ((0, Kp - K), (0, 0))).astype(compute_dtype)

    # Conv bias cancels exactly under training-mode BatchNorm (batch mean is
    # subtracted right after), so it is folded away with zero numerical effect.
    # TODO(synk): BatchNorm2d running_mean / running_var are not tracked
    # (training-mode forward only); in eval mode the bias would matter.
    del bias

    # One-hot fold / tile matrices for the per-channel stats reduce & broadcast.
    p_mat = jnp.tile(jnp.eye(OC, dtype=jnp.float32), (1, OW))     # (OC, OW*OC)
    pt_mat = p_mat.T                                              # (OW*OC, OC)

    gamma_row = jnp.tile(gamma.astype(jnp.float32), OW)[None, :]  # (1, OW*OC)
    beta_row = jnp.tile(beta.astype(jnp.float32), OW)[None, :]

    kernel = functools.partial(_cnn_block_kernel, eps=eps,
                               inv_count=1.0 / float(N * OH * OW))

    out2d = pl.pallas_call(
        kernel,
        grid=(1,),
        out_shape=jax.ShapeDtypeStruct((M, LANES), x_nchw.dtype),
        in_specs=[
            pl.BlockSpec((M, Kp), lambda i: (0, 0)),
            pl.BlockSpec((Kp, LANES), lambda i: (0, 0)),
            pl.BlockSpec((LANES, OC), lambda i: (0, 0)),
            pl.BlockSpec((OC, LANES), lambda i: (0, 0)),
            pl.BlockSpec((1, LANES), lambda i: (0, 0)),
            pl.BlockSpec((1, LANES), lambda i: (0, 0)),
            pl.BlockSpec(memory_space=pltpu.MemorySpace.SMEM),
        ],
        out_specs=pl.BlockSpec((M, LANES), lambda i: (0, 0)),
        compiler_params=pltpu.CompilerParams(
            dimension_semantics=("arbitrary",)),
    )(lhs, w_big, pt_mat, p_mat, gamma_row, beta_row,
      jnp.reshape(alpha, (1, 1)).astype(jnp.float32))

    out = out2d.reshape(N, OH, OW, OC)
    # TODO(synk): when CNNBlocks are chained, return NHWC here and drop this
    # transpose (and the leading one of the next block); NCHW is kept only to
    # match the PyTorch interface.
    return jnp.transpose(out, (0, 3, 1, 2))


def _reference(x, w, b, gamma, beta, alpha, eps=1e-5):
    y = lax.conv_general_dilated(x, w, (1, 1), ((1, 1), (1, 1)),
                                 dimension_numbers=('NCHW', 'OIHW', 'NCHW'))
    y = y + b[None, :, None, None]
    mean = jnp.mean(y, axis=(0, 2, 3), keepdims=True)
    var = jnp.mean((y - mean) ** 2, axis=(0, 2, 3), keepdims=True)
    z = (y - mean) / jnp.sqrt(var + eps) * gamma[None, :, None, None] \
        + beta[None, :, None, None]
    return jnp.where(z >= 0, z, alpha * z)


if __name__ == "__main__":
    # CNNBlock(in_channels=4, out_channels=8, kernel_size=3, stride=1, padding=1)
    N, C, H, W = 2, 4, 16, 16
    OC, KH, KW = 8, 3, 3

    key = jax.random.PRNGKey(0)
    kx, kw, kb = jax.random.split(key, 3)
    x = jax.random.normal(kx, (N, C, H, W), jnp.float32)
    w = jax.random.normal(kw, (OC, C, KH, KW), jnp.float32) * 0.1
    b = jax.random.normal(kb, (OC,), jnp.float32) * 0.1
    gamma = jnp.ones((OC,), jnp.float32)        # BatchNorm2d weight init
    beta = jnp.zeros((OC,), jnp.float32)        # BatchNorm2d bias init
    alpha = jnp.float32(0.25)                   # PReLU init

    ref = _reference(x, w, b, gamma, beta, alpha)

    # f32 matmul operands: strict check against the f32 reference.
    out = cnn_block_forward(x, w, b, gamma, beta, alpha, padding=1)
    out = jax.block_until_ready(out)
    assert out.shape == (N, OC, H, W), out.shape
    assert jnp.allclose(out, ref, rtol=1e-4, atol=1e-4), \
        float(jnp.max(jnp.abs(out - ref)))

    # bf16 matmul operands (perf-review item): f32 accumulate, loose tolerance.
    out_bf16 = cnn_block_forward(x, w, b, gamma, beta, alpha, padding=1,
                                 compute_dtype=jnp.bfloat16)
    out_bf16 = jax.block_until_ready(out_bf16)
    assert out_bf16.shape == (N, OC, H, W), out_bf16.shape
    assert jnp.allclose(out_bf16, ref, rtol=0.1, atol=0.2), \
        float(jnp.max(jnp.abs(out_bf16 - ref)))

    print("KERNEL_OK")
</pallas_src>

<mosaic_0001>
module attributes {stable_mosaic.version = 11 : i64} {
  func.func @_cnn_block_kernel(%arg0: i32, %arg1: memref<32x256xf32, #tpu.memory_space<vmem>>, %arg2: memref<256x128xf32, #tpu.memory_space<vmem>>, %arg3: memref<128x8xf32, #tpu.memory_space<vmem>>, %arg4: memref<8x128xf32, #tpu.memory_space<vmem>>, %arg5: memref<1x128xf32, #tpu.memory_space<vmem>>, %arg6: memref<1x128xf32, #tpu.memory_space<vmem>>, %arg7: memref<1x1xf32, #tpu.memory_space<smem>>, %arg8: memref<32x128xf32, #tpu.memory_space<vmem>>) attributes {dimension_semantics = [#tpu.dimension_semantics<arbitrary>], iteration_bounds = array<i64: 1>, scalar_prefetch = 0 : i64, scratch_operands = 0 : i64, tpu.core_type = #tpu.core_type<tc>, window_params = [{pipeline_mode = #tpu.pipeline_mode<synchronous>, transform_indices = @transform_0, window_bounds = array<i64: 32, 256>}, {pipeline_mode = #tpu.pipeline_mode<synchronous>, transform_indices = @transform_1, window_bounds = array<i64: 256, 128>}, {pipeline_mode = #tpu.pipeline_mode<synchronous>, transform_indices = @transform_2, window_bounds = array<i64: 128, 8>}, {pipeline_mode = #tpu.pipeline_mode<synchronous>, transform_indices = @transform_3, window_bounds = array<i64: 8, 128>}, {pipeline_mode = #tpu.pipeline_mode<synchronous>, transform_indices = @transform_4, window_bounds = array<i64: 1, 128>}, {pipeline_mode = #tpu.pipeline_mode<synchronous>, transform_indices = @transform_5, window_bounds = array<i64: 1, 128>}, {transform_indices = @transform_6, window_bounds = array<i64: 1, 1>}, {pipeline_mode = #tpu.pipeline_mode<synchronous>, transform_indices = @transform_7, window_bounds = array<i64: 32, 128>}]} {
    %c0 = arith.constant 0 : index
    %c0_0 = arith.constant 0 : index
    %0 = vector.load %arg1[%c0, %c0_0] : memref<32x256xf32, #tpu.memory_space<vmem>>, vector<32x256xf32>
    %c0_1 = arith.constant 0 : index
    %c0_2 = arith.constant 0 : index
    %1 = vector.load %arg2[%c0_1, %c0_2] : memref<256x128xf32, #tpu.memory_space<vmem>>, vector<256x128xf32>
    %cst = arith.constant dense<0.000000e+00> : vector<32x128xf32>
    %2 = tpu.matmul %0, %1, %cst {dimension_numbers = #tpu.dot_dimension_numbers<[1], [0], [0], [1], [0, 0, 1, 1], [], []>} : vector<32x256xf32>, vector<256x128xf32>, vector<32x128xf32> -> vector<32x128xf32>
    %cst_3 = arith.constant dense<0.000000e+00> : vector<128xf32>
    %3 = vector.multi_reduction <add>, %2, %cst_3 [0] : vector<32x128xf32> to vector<128xf32>
    %4 = vector.shape_cast %3 : vector<128xf32> to vector<1x128xf32>
    %5 = arith.mulf %2, %2 : vector<32x128xf32>
    %cst_4 = arith.constant dense<0.000000e+00> : vector<128xf32>
    %6 = vector.multi_reduction <add>, %5, %cst_4 [0] : vector<32x128xf32> to vector<128xf32>
    %7 = vector.shape_cast %6 : vector<128xf32> to vector<1x128xf32>
    %8 = tpu.concatenate %4, %7 in 0 : vector<1x128xf32>, vector<1x128xf32> -> vector<2x128xf32>
    %c0_5 = arith.constant 0 : index
    %c0_6 = arith.constant 0 : index
    %9 = vector.load %arg3[%c0_5, %c0_6] : memref<128x8xf32, #tpu.memory_space<vmem>>, vector<128x8xf32>
    %cst_7 = arith.constant dense<0.000000e+00> : vector<2x8xf32>
    %10 = tpu.matmul %8, %9, %cst_7 {dimension_numbers = #tpu.dot_dimension_numbers<[1], [0], [0], [1], [0, 0, 1, 1], [], []>} : vector<2x128xf32>, vector<128x8xf32>, vector<2x8xf32> -> vector<2x8xf32>
    %cst_8 = arith.constant 0.001953125 : f32
    %11 = vector.broadcast %cst_8 : f32 to vector<2x8xf32>
    %12 = arith.mulf %10, %11 : vector<2x8xf32>
    %13 = vector.extract_strided_slice %12 {offsets = [0, 0], sizes = [1, 8], strides = [1, 1]} : vector<2x8xf32> to vector<1x8xf32>
    %14 = vector.extract_strided_slice %12 {offsets = [1, 0], sizes = [1, 8], strides = [1, 1]} : vector<2x8xf32> to vector<1x8xf32>
    %15 = arith.mulf %13, %13 : vector<1x8xf32>
    %16 = arith.subf %14, %15 : vector<1x8xf32>
    %cst_9 = arith.constant 0.000000e+00 : f32
    %17 = vector.broadcast %cst_9 : f32 to vector<1x8xf32>
    %18 = arith.maximumf %16, %17 : vector<1x8xf32>
    %19 = tpu.concatenate %13, %18 in 0 : vector<1x8xf32>, vector<1x8xf32> -> vector<2x8xf32>
    %c0_10 = arith.constant 0 : index
    %c0_11 = arith.constant 0 : index
    %20 = vector.load %arg4[%c0_10, %c0_11] : memref<8x128xf32, #tpu.memory_space<vmem>>, vector<8x128xf32>
    %cst_12 = arith.constant dense<0.000000e+00> : vector<2x128xf32>
    %21 = tpu.matmul %19, %20, %cst_12 {dimension_numbers = #tpu.dot_dimension_numbers<[1], [0], [0], [1], [0, 0, 1, 1], [], []>} : vector<2x8xf32>, vector<8x128xf32>, vector<2x128xf32> -> vector<2x128xf32>
    %22 = vector.extract_strided_slice %21 {offsets = [1, 0], sizes = [1, 128], strides = [1, 1]} : vector<2x128xf32> to vector<1x128xf32>
    %cst_13 = arith.constant 9.99999974E-6 : f32
    %23 = vector.broadcast %cst_13 : f32 to vector<1x128xf32>
    %24 = arith.addf %22, %23 : vector<1x128xf32>
    %25 = math.rsqrt %24 : vector<1x128xf32>
    %c0_14 = arith.constant 0 : index
    %c0_15 = arith.constant 0 : index
    %26 = vector.load %arg5[%c0_14, %c0_15] : memref<1x128xf32, #tpu.memory_space<vmem>>, vector<1x128xf32>
    %27 = arith.mulf %26, %25 : vector<1x128xf32>
    %c0_16 = arith.constant 0 : index
    %c0_17 = arith.constant 0 : index
    %28 = vector.load %arg6[%c0_16, %c0_17] : memref<1x128xf32, #tpu.memory_space<vmem>>, vector<1x128xf32>
    %29 = vector.extract_strided_slice %21 {offsets = [0, 0], sizes = [1, 128], strides = [1, 1]} : vector<2x128xf32> to vector<1x128xf32>
    %30 = arith.mulf %29, %27 : vector<1x128xf32>
    %31 = arith.subf %28, %30 : vector<1x128xf32>
    %32 = vector.broadcast %27 : vector<1x128xf32> to vector<32x128xf32>
    %33 = arith.mulf %2, %32 : vector<32x128xf32>
    %34 = vector.broadcast %31 : vector<1x128xf32> to vector<32x128xf32>
    %35 = arith.addf %33, %34 : vector<32x128xf32>
    %c0_18 = arith.constant 0 : index
    %c0_19 = arith.constant 0 : index
    %36 = memref.load %arg7[%c0_18, %c0_19] : memref<1x1xf32, #tpu.memory_space<smem>>
    %cst_20 = arith.constant 0.000000e+00 : f32
    %37 = vector.broadcast %cst_20 : f32 to vector<32x128xf32>
    %38 = arith.cmpf oge, %35, %37 : vector<32x128xf32>
    %39 = vector.broadcast %36 : f32 to vector<32x128xf32>
    %40 = arith.mulf %39, %35 : vector<32x128xf32>
    %41 = arith.select %38, %35, %40 : vector<32x128xi1>, vector<32x128xf32>
    %c0_21 = arith.constant 0 : index
    %c0_22 = arith.constant 0 : index
    %42 = vector.load %arg8[%c0_21, %c0_22] : memref<32x128xf32, #tpu.memory_space<vmem>>, vector<32x128xf32>
    tpu.vector_store %arg8[%c0_21, %c0_22], %41 {strides = array<i32>} : memref<32x128xf32, #tpu.memory_space<vmem>>, vector<32x128xf32>,
    return
  }
  func.func @transform_0(%arg0: i32) -> (i32, i32) {
    %c0_i32 = arith.constant 0 : i32
    %c0_i32_0 = arith.constant 0 : i32
    %c0_i32_1 = arith.constant 0 : i32
    return %c0_i32, %c0_i32_0 : i32, i32
  }
  func.func @transform_1(%arg0: i32) -> (i32, i32) {
    %c0_i32 = arith.constant 0 : i32
    %c0_i32_0 = arith.constant 0 : i32
    %c0_i32_1 = arith.constant 0 : i32
    return %c0_i32, %c0_i32_0 : i32, i32
  }
  func.func @transform_2(%arg0: i32) -> (i32, i32) {
    %c0_i32 = arith.constant 0 : i32
    %c0_i32_0 = arith.constant 0 : i32
    %c0_i32_1 = arith.constant 0 : i32
    return %c0_i32, %c0_i32_0 : i32, i32
  }
  func.func @transform_3(%arg0: i32) -> (i32, i32) {
    %c0_i32 = arith.constant 0 : i32
    %c0_i32_0 = arith.constant 0 : i32
    %c0_i32_1 = arith.constant 0 : i32
    return %c0_i32, %c0_i32_0 : i32, i32
  }
  func.func @transform_4(%arg0: i32) -> (i32, i32) {
    %c0_i32 = arith.constant 0 : i32
    %c0_i32_0 = arith.constant 0 : i32
    %c0_i32_1 = arith.constant 0 : i32
    return %c0_i32, %c0_i32_0 : i32, i32
  }
  func.func @transform_5(%arg0: i32) -> (i32, i32) {
    %c0_i32 = arith.constant 0 : i32
    %c0_i32_0 = arith.constant 0 : i32
    %c0_i32_1 = arith.constant 0 : i32
    return %c0_i32, %c0_i32_0 : i32, i32
  }
  func.func @transform_6(%arg0: i32) -> (i32, i32) {
    %c0_i32 = arith.constant 0 : i32
    %c0_i32_0 = arith.constant 0 : i32
    %c0_i32_1 = arith.constant 0 : i32
    return %c0_i32, %c0_i32_0 : i32, i32
  }
  func.func @transform_7(%arg0: i32) -> (i32, i32) {
    %c0_i32 = arith.constant 0 : i32
    %c0_i32_0 = arith.constant 0 : i32
    %c0_i32_1 = arith.constant 0 : i32
    return %c0_i32, %c0_i32_0 : i32, i32
  }
}

</mosaic_0001>

<bundles_post_ra>
// kernel: tpu_custom_call.1
= control target key start
LH: loop header
LB: loop body
LE: loop exit
PB: predicated region body
PF: predicated region fallthrough
CT: control target
= control target key end

     0   :  { %13 = vsyncpa [#allocation4], 0  ;;  %s841_s0 = inlined_call_operand.vmem [shape: f32[32,256], index: 0, kind: input, shape index: {}]   ;;  %s842_s1 = inlined_call_operand.hbm [shape: f32[256,128], index: 1, kind: input, shape index: {}]   ;;  %s843_s2 = inlined_call_operand.vmem [shape: f32[128,8], index: 2, kind: input, shape index: {}]   ;;  %s844_s3 = inlined_call_operand.vmem [shape: f32[8,128], index: 3, kind: input, shape index: {}]   ;;  %s845_s4 = inlined_call_operand.vmem [shape: f32[1,128], index: 4, kind: input, shape index: {}]   ;;  %s846_s5 = inlined_call_operand.vmem [shape: f32[1,128], index: 5, kind: input, shape index: {}]   ;;  %s847_s6 = inlined_call_operand.<no memory space> [shape: f32[1,1], index: 6, kind: input, shape index: {}]   ;;  %s848_s7 = inlined_call_operand.hbm [shape: f32[32,128], index: 7, kind: output, shape index: {}]  }
   0x1   :  { %14 = vsyncpa [#allocation5], 0  ;;  %s657_s24 = smov [#allocation3]   ;;  %s609_s28 = scalar_lea.hbm %s842_s1, 4096 }
   0x2   :  { %s22_s25 = sshll.u32 %s657_s24, 4  ;;  %p610_p0 = scmp.ne.s32.totalorder %s842_s1, %s609_s28  ;;  %s23_s25 = int_to_ptr.vmem [resolvable:$true] %s22_s25 }
   0x3   :  { %p613_p1 = scmp.lt.u32.totalorder %s609_s28, %s842_s1 }
   0x5   :  { %p615_p2 = pnand %p613_p1, %p610_p0 }
   0x7   :  { %618 = shalt.err (!%p615_p2)
}
   0x8   :  { %s619_s10 = scalar_lea.vmem %s23_s25, 4096  ;;  %p624_p4 = scmp.lt.s32.totalorder %s23_s25, %s23_s25 }
   0x9   :  { %p620_p3 = scmp.ne.s32.totalorder %s23_s25, %s619_s10  ;;  %p625_p5 = scmp.lt.s32.totalorder %s619_s10, %s619_s10 }
   0xb   :  { %p626_p6 = por %p625_p5, %p624_p4 }
   0xd   :  { %p627_p7 = pnand %p626_p6, %p620_p3 }
   0xf   :  { %630 = shalt.err (!%p627_p7)
}
  0x10   :  { %s658_s11 = smov 128   ;;  %s659_s12 = smov 8  }
  0x11   :  { %28 = dma.hbm_to_vmem [thread:$0]  %s842_s1, 4096, %s23_s25, [#allocation4], %s658_s11, %s658_s11, %s659_s12  }
  0x12   :  { %653 = dma.done.wait [#allocation4], 4096  }
  0x13   :  { %654 = vsyncadd [#allocation4], 4294963200  ;;  %v66_v0 = vld [vmem:[#allocation3 + $0x80] sm:$0xff]  ;;  %v67_v1 = vld [vmem:[#allocation3 + $0x88] sm:$0xff]  ;;  %v660_v59 = vmov 0.0|0.0   ;;  %vm661_vm0 = vmmov 0  }
  0x14   :  { %v50_v2 = vld [vmem:[#allocation3] sm:$0xff]  ;;  %v543_v3 = vpack.c.bf16 %v67_v1, %v66_v0  ;;  %v51_v4 = vld [vmem:[#allocation3 + $0x8] sm:$0xff]  ;;  %v68_v5 = vld [vmem:[#allocation3 + $0x90] sm:$0xff]  ;;  %575 = vmatprep.subr.bf16.mxu1 %v660_v59  ;;  %vm189_vm1 = vcmask 1040384   ;;  %vm286_vm2 = vcmask 64512  }
  0x15   :  { %v69_v6 = vld [vmem:[#allocation3 + $0x98] sm:$0xff]  ;;  %v545_v7 = vpack.c.bf16 %v51_v4, %v50_v2  ;;  %v52_v9 = vld [vmem:[#allocation3 + $0x10] sm:$0xff]  ;;  %v70_v11 = vld [vmem:[#allocation3 + $0xa0] sm:$0xff] }
  0x16   :  { %v547_v8 = vpack.c.bf16 %v69_v6, %v68_v5  ;;  %v53_v10 = vld [vmem:[#allocation3 + $0x18] sm:$0xff]  ;;  %544 = vmatprep.subr.bf16.mxu0 %v543_v3  ;;  %v71_v12 = vld [vmem:[#allocation3 + $0xa8] sm:$0xff]  ;;  %v54_v15 = vld [vmem:[#allocation3 + $0x20] sm:$0xff] }
  0x17   :  { %546 = vmatpush3.bf16.msra.mxu0 %v545_v7  ;;  %v549_v13 = vpack.c.bf16 %v53_v10, %v52_v9  ;;  %v551_v14 = vpack.c.bf16 %v71_v12, %v70_v11  ;;  %v55_v16 = vld [vmem:[#allocation3 + $0x28] sm:$0xff]  ;;  %v72_v17 = vld [vmem:[#allocation3 + $0xb0] sm:$0xff]  ;;  %v73_v18 = vld [vmem:[#allocation3 + $0xb8] sm:$0xff] }
  0x18   :  { %548 = vmatprep.subr.bf16.mxu0 %v547_v8  ;;  %v553_v19 = vpack.c.bf16 %v55_v16, %v54_v15  ;;  %v555_v20 = vpack.c.bf16 %v73_v18, %v72_v17  ;;  %v56_v21 = vld [vmem:[#allocation3 + $0x30] sm:$0xff]  ;;  %v57_v22 = vld [vmem:[#allocation3 + $0x38] sm:$0xff]  ;;  %v74_v23 = vld [vmem:[#allocation3 + $0xc0] sm:$0xff]  ;;  %v662_v16 = vmov 0.0  }
  0x19   :  { %v75_v24 = vld [vmem:[#allocation3 + $0xc8] sm:$0xff]  ;;  %v557_v26 = vpack.c.bf16 %v57_v22, %v56_v21  ;;  %v58_v28 = vld [vmem:[#allocation3 + $0x40] sm:$0xff]  ;;  %v76_v30 = vld [vmem:[#allocation3 + $0xd0] sm:$0xff]  ;;  %535 = vmatprep.mubr.msk.f32.mxu1 %vm661_vm0, %v662_v16 }
  0x1a   :  { %v43_v25 = vld [vmem:[%s841_s0 + $0x8] sm:$0xff]  ;;  %v559_v27 = vpack.c.bf16 %v75_v24, %v74_v23  ;;  %v77_v31 = vld [vmem:[#allocation3 + $0xd8] sm:$0xff]  ;;  %v60_v34 = vld [vmem:[#allocation3 + $0x50] sm:$0xff] }
  0x1b   :  { %550 = vmatpush3.bf16.msra.mxu0 %v549_v13  ;;  %146 = vmatprep.mubr.f32.mxu0 %v43_v25  ;;  %v59_v29 = vld [vmem:[#allocation3 + $0x48] sm:$0xff]  ;;  %v563_v33 = vpack.c.bf16 %v77_v31, %v76_v30  ;;  %v61_v35 = vld [vmem:[#allocation3 + $0x58] sm:$0xff]  ;;  %v78_v36 = vld [vmem:[#allocation3 + $0xe0] sm:$0xff] }
  0x1c   :  { %552 = vmatprep.subr.bf16.mxu0 %v551_v14  ;;  %v561_v32 = vpack.c.bf16 %v59_v29, %v58_v28  ;;  %v79_v37 = vld [vmem:[#allocation3 + $0xe8] sm:$0xff]  ;;  %v565_v38 = vpack.c.bf16 %v61_v35, %v60_v34  ;;  %v62_v40 = vld [vmem:[#allocation3 + $0x60] sm:$0xff]  ;;  %v80_v42 = vld [vmem:[#allocation3 + $0xf0] sm:$0xff] }
  0x1d   :  { %v567_v39 = vpack.c.bf16 %v79_v37, %v78_v36  ;;  %v63_v41 = vld [vmem:[#allocation3 + $0x68] sm:$0xff]  ;;  %v81_v43 = vld [vmem:[#allocation3 + $0xf8] sm:$0xff]  ;;  %v64_v46 = vld [vmem:[#allocation3 + $0x70] sm:$0xff] }
  0x1e   :  { %v569_v44 = vpack.c.bf16 %v63_v41, %v62_v40  ;;  %v571_v45 = vpack.c.bf16 %v81_v43, %v80_v42  ;;  %v65_v47 = vld [vmem:[#allocation3 + $0x78] sm:$0xff]  ;;  %v42_v49 = vld [vmem:[%s841_s0] sm:$0xff]  ;;  %v44_v51 = vld [vmem:[%s841_s0 + $0x10] sm:$0xff] }
  0x1f   :  { %554 = vmatpush3.bf16.msra.mxu0 %v553_v19  ;;  %v573_v48 = vpack.c.bf16 %v65_v47, %v64_v46  ;;  %v45_v50 = vld [vmem:[%s841_s0 + $0x18] sm:$0xff]  ;;  %v47_v52 = vld [vmem:[%s841_s0 + $0x28] sm:$0xff]  ;;  %v46_v53 = vld [vmem:[%s841_s0 + $0x20] sm:$0xff] }
  0x20   :  { %556 = vmatprep.subr.bf16.mxu0 %v555_v20  ;;  %v49_v54 = vld [vmem:[%s841_s0 + $0x38] sm:$0xff]  ;;  %v48_v55 = vld [vmem:[%s841_s0 + $0x30] sm:$0xff]  ;;  %v191_v56 = vld [vmem:[%s843_s2] sm:$0xff] }
  0x21   :  { %v192_v57 = vld [vmem:[%s843_s2 + $0x8] sm:$0xff]  ;;  %v193_v60 = vld [vmem:[%s843_s2 + $0x10] sm:$0xff]  ;;  %v194_v61 = vld [vmem:[%s843_s2 + $0x18] sm:$0xff] }
  0x22   :  { %v576_v58 = vpack.c.bf16 %v192_v57, %v191_v56  ;;  %v579_v62 = vpack.c.bf16 %v194_v61, %v193_v60  ;;  %v195_v63 = vld [vmem:[%s843_s2 + $0x20] sm:$0xff]  ;;  %v196_v0 = vld [vmem:[%s843_s2 + $0x28] sm:$0xff]  ;;  %v197_v2 = vld [vmem:[%s843_s2 + $0x30] sm:$0xff] }
  0x23   :  { %558 = vmatpush3.bf16.msra.mxu0 %v557_v26  ;;  %v582_v1 = vpack.c.bf16 %v196_v0, %v195_v63  ;;  %v198_v3 = vld [vmem:[%s843_s2 + $0x38] sm:$0xff]  ;;  %v199_v5 = vld [vmem:[%s843_s2 + $0x40] sm:$0xff]  ;;  %v200_v6 = vld [vmem:[%s843_s2 + $0x48] sm:$0xff] }
  0x24   :  { %560 = vmatprep.subr.bf16.mxu0 %v559_v27  ;;  %577 = vmatpush3.bf16.msra.mxu1 %v576_v58  ;;  %v585_v4 = vpack.c.bf16 %v198_v3, %v197_v2  ;;  %v588_v7 = vpack.c.bf16 %v200_v6, %v199_v5  ;;  %v201_v8 = vld [vmem:[%s843_s2 + $0x50] sm:$0xff]  ;;  %v202_v9 = vld [vmem:[%s843_s2 + $0x58] sm:$0xff]  ;;  %v203_v11 = vld [vmem:[%s843_s2 + $0x60] sm:$0xff]  ;;  %v367_v3 = vlaneseq }
  0x25   :  { %578 = vmatprep.subr.bf16.mxu1 %v660_v59  ;;  %v591_v10 = vpack.c.bf16 %v202_v9, %v201_v8  ;;  %v204_v12 = vld [vmem:[%s843_s2 + $0x68] sm:$0xff]  ;;  %v205_v14 = vld [vmem:[%s843_s2 + $0x70] sm:$0xff]  ;;  %v206_v15 = vld [vmem:[%s843_s2 + $0x78] sm:$0xff] }
  0x26   :  { %v594_v13 = vpack.c.bf16 %v204_v12, %v203_v11  ;;  %v597_v17 = vpack.c.bf16 %v206_v15, %v205_v14  ;;  %v368_v5 = vshrl.u32 %v367_v3, 7  ;;  %v381_v14 = vld [vmem:[%s846_s5] sm:$0x1]  ;;  %s664_s5 = smov [#allocation6]  }
  0x27   :  { %562 = vmatpush3.bf16.msra.mxu0 %v561_v32  ;;  %s427_s21 = sshll.u32 %s664_s5, 4  ;;  %s428_s21 = int_to_ptr.vmem [resolvable:$true] %s427_s21 }
  0x28   :  { %564 = vmatprep.subr.bf16.mxu0 %v563_v33  ;;  %580 = vmatpush3.bf16.msra.mxu1 %v579_v62  ;;  %v387_v12 = vsub.s32 0, %v368_v5  ;;  %p636_p9 = scmp.lt.s32.totalorder %s428_s21, %s428_s21 }
  0x29   :  { %581 = vmatprep.subr.bf16.mxu1 %v660_v59 }
  0x2b   :  { %566 = vmatpush3.bf16.msra.mxu0 %v565_v38 }
  0x2c   :  { %568 = vmatprep.subr.bf16.mxu0 %v567_v39  ;;  %583 = vmatpush3.bf16.msra.mxu1 %v582_v1  ;;  %v663_v1 = vmov 1966171168  }
  0x2d   :  { %584 = vmatprep.subr.bf16.mxu1 %v660_v59  ;;  %v365_v2 = vunpack.c.l.s4 %v663_v1 }
  0x2f   :  { %570 = vmatpush3.bf16.msra.mxu0 %v569_v44 }
  0x30   :  { %572 = vmatprep.subr.bf16.mxu0 %v571_v45  ;;  %586 = vmatpush3.bf16.msra.mxu1 %v585_v4  ;;  %v366_v4 = vunpack.c.0.s8 %v365_v2 }
  0x31   :  { %587 = vmatprep.subr.bf16.mxu1 %v660_v59 }
  0x32   :  { %v369_v6 = vsub.s32 %v366_v4, %v368_v5 }
  0x33   :  { %574 = vmatpush3.bf16.msra.mxu0 %v573_v48 }
  0x34   :  { %589 = vmatpush3.bf16.msra.mxu1 %v588_v7 }
  0x35   :  { %590 = vmatprep.subr.bf16.mxu1 %v660_v59 }
  0x36   :  { %147 = vmatmul.mubr.f32.vlgmr.msra.gmra.mrb[0].mxu0 %v42_v49 }
  0x37   :  { %151 = vmatprep.mubr.f32.mxu0 %v45_v50 }
  0x38   :  { %592 = vmatpush3.bf16.msra.mxu1 %v591_v10  ;;  %v362_v10 = vld [vmem:[%s845_s4] sm:$0x1] }
  0x39   :  { %593 = vmatprep.subr.bf16.mxu1 %v660_v59 }
  0x3a   :  { %152 = vmatmul.mubr.f32.gmra.mrb[2].mxu0 %v44_v51 }
  0x3b   :  { %156 = vmatprep.mubr.f32.mxu0 %v47_v52 }
  0x3c   :  { %595 = vmatpush3.bf16.msra.mxu1 %v594_v13 }
  0x3d   :  { %596 = vmatprep.subr.bf16.mxu1 %v660_v59 }
  0x3e   :  { %157 = vmatmul.mubr.f32.gmra.mrb[4].mxu0 %v46_v53  ;;  %v285_v53 = vld [vmem:[%s844_s3] sm:$0xff] }
  0x3f   :  { %161 = vmatprep.mubr.f32.mxu0 %v49_v54 }
  0x40   :  { %598 = vmatpush3.bf16.msra.mxu1 %v597_v17 }
  0x41   :  { %538 = vmatprep.subr.mxu1 %v662_v16 }
  0x42   :  { %162 = vmatmul.mubr.f32.gmra.mrb[6].mxu0 %v48_v55 }
 0x109   :  { %v472_v18 = vpop.f32.mrb[0].mxu0 }
 0x10a   :  { %v473_v19 = vpop.f32.mrb[1].mxu0 }
 0x10b   :  { %v793_v20 = vadd.f32 %v473_v19, %v472_v18 }
 0x10d   :  { %v475_v21 = vpop.f32.mrb[2].mxu0  ;;  %v176_v28 = vmul.f32 %v793_v20, %v793_v20 }
 0x10e   :  { %v476_v22 = vpop.f32.mrb[3].mxu0 }
 0x10f   :  { %v795_v23 = vadd.f32 %v476_v22, %v475_v21 }
 0x111   :  { %v478_v24 = vpop.f32.mrb[4].mxu0  ;;  %v177_v26 = vmul.f32 %v795_v23, %v795_v23  ;;  %v167_v29 = vadd.f32 %v795_v23, %v793_v20 }
 0x112   :  { %v479_v25 = vpop.f32.mrb[5].mxu0 }
 0x113   :  { %v799_v27 = vadd.f32 %v479_v25, %v478_v24  ;;  %v180_v33 = vadd.f32 %v177_v26, %v176_v28  ;;  %v409_v25 = vstv %s847_s6  ;;  %s631_s6 = scalar_lea.vmem %s428_s21, 512 }
 0x114   :  { %p632_p8 = scmp.ne.s32.totalorder %s428_s21, %s631_s6  ;;  %p637_p10 = scmp.lt.s32.totalorder %s631_s6, %s631_s6 }
 0x115   :  { %v178_v30 = vmul.f32 %v799_v27, %v799_v27  ;;  %v481_v31 = vpop.f32.mrb[6].mxu0  ;;  %v168_v34 = vadd.f32 %v799_v27, %v167_v29 }
 0x116   :  { %v482_v32 = vpop.f32.mrb[7].mxu0  ;;  %p638_p11 = por %p637_p10, %p636_p9 }
 0x117   :  { %v483_v35 = vadd.f32 %v482_v32, %v481_v31  ;;  %v181_v36 = vadd.f32 %v180_v33, %v178_v30 }
 0x118   :  { %p639_p12 = pnand %p638_p11, %p632_p8 }
 0x119   :  { %v169_v37 = vadd.f32 %v483_v35, %v168_v34  ;;  %v179_v38 = vmul.f32 %v483_v35, %v483_v35 }
 0x11b   :  { %v170_v39 = vrot.slane %v169_v37, 4  ;;  %v182_v40 = vadd.f32 %v181_v36, %v179_v38 }
 0x11d   :  { %v171_v41 = vadd.f32 %v170_v39, %v169_v37  ;;  %v183_v42 = vrot.slane %v182_v40, 4 }
 0x11f   :  { %v172_v43 = vrot.slane %v171_v41, 2  ;;  %v184_v44 = vadd.f32 %v183_v42, %v182_v40 }
 0x121   :  { %v173_v45 = vadd.f32 %v172_v43, %v171_v41  ;;  %v185_v46 = vrot.slane %v184_v44, 2 }
 0x123   :  { %v174_v47 = vrot.slane %v173_v45, 1  ;;  %v186_v48 = vadd.f32 %v185_v46, %v184_v44 }
 0x125   :  { %v187_v49 = vrot.slane %v186_v48, 1  ;;  %v175_v50 = vadd.f32 %v174_v47, %v173_v45 }
 0x127   :  { %v188_v51 = vadd.f32 %v187_v49, %v186_v48 }
 0x129   :  { %v190_v52 = vsel %vm189_vm1, %v175_v50, %v188_v51 }
 0x12a   :  { %536 = vmatmul.mubr.f32.vlgmr.msra.gmra.mrb[0].mxu1 %v190_v52 }
 0x12b   :  { %540 = vmatprep.mubr.msk.f32.mxu1 %vm661_vm0, %v662_v16  ;;  %539 = vmatpush3.msra.mxu1 %v285_v53 }
 0x1fd   :  { %v273_v54 = vpop.f32.mrb[0].mxu1 }
 0x1fe   :  { %v277_v55 = vmul.f32 0.001953125, %v273_v54  ;;  %v537_v56 = vpop.f32.mrb[1].mxu1 }
 0x200   :  { %v278_v57 = vmul.f32 %v277_v55, %v277_v55 }
 0x202   :  { %v280_v58 = vrot.slane %v278_v57, 7 }
 0x204   :  { %v282_v59 = vsub.f32 %v277_v55, %v280_v58 }
 0x206   :  { %v283_v60 = vmax.f32 %v282_v59, 0.0 }
 0x208   :  { %v284_v61 = vsel %vm189_vm1, %v277_v55, %v283_v60 }
 0x209   :  { %541 = vmatmul.mubr.msk.f32.vlgmr.msra.gmra.mrb[2].mxu1 %vm286_vm2, %v284_v61 }
 0x2dc   :  { %v356_v62 = vpop.f32.mrb[2].mxu1 }
 0x2dd   :  { %v360_v63 = vadd.f32 1e-05, %v356_v62  ;;  %v542_v0 = vpop.f32.mrb[3].mxu1 }
 0x2df   :  { %607 = vrsqrt.f32 %v360_v63 }
 0x2e9   :  { %v608_v7 = vpop.eup %607 }
 0x2ea   :  { %v370_v8 = vrot.slane %v608_v7, %v369_v6 }
 0x2ec   :  { %v371_v9 = vcombine.high %v370_v8, %v370_v8 }
 0x2ee   :  { %v378_v11 = vrot.slane %v371_v9, %v369_v6 }
 0x2f0   :  { %v380_v13 = vmul.f32 %v378_v11, %v362_v10 }
 0x2f2   :  { %v382_v15 = vmul.f32 %v380_v13, %v356_v62  ;;  %v388_v16 = vrot.slane %v380_v13, %v387_v12 }
 0x2f4   :  { %v383_v17 = vsub.f32 %v381_v14, %v382_v15  ;;  %v390_v18 = vmul.f32 %v793_v20, %v388_v16  ;;  %v391_v19 = vmul.f32 %v795_v23, %v388_v16  ;;  %v392_v21 = vmul.f32 %v799_v27, %v388_v16 }
 0x2f5   :  { %v393_v22 = vmul.f32 %v483_v35, %v388_v16 }
 0x2f6   :  { %v398_v24 = vrot.slane %v383_v17, %v387_v12 }
 0x2f8   :  { %v400_v26 = vadd.f32 %v398_v24, %v390_v18  ;;  %v401_v28 = vadd.f32 %v398_v24, %v391_v19  ;;  %v402_v29 = vadd.f32 %v398_v24, %v392_v21  ;;  %v403_v30 = vadd.f32 %v398_v24, %v393_v22 }
 0x2fa   :  { %vm405_vm3 = vcmp.ge.f32.partialorder %v400_v26, 0.0  ;;  %vm406_vm4 = vcmp.ge.f32.partialorder %v401_v28, 0.0  ;;  %vm407_vm5 = vcmp.ge.f32.partialorder %v402_v29, 0.0  ;;  %vm408_vm6 = vcmp.ge.f32.partialorder %v403_v30, 0.0 }
 0x2fb   :  { %v410_v20 = vmul.f32 %v409_v25, %v400_v26  ;;  %v411_v23 = vmul.f32 %v409_v25, %v401_v28  ;;  %v412_v31 = vmul.f32 %v409_v25, %v402_v29  ;;  %v413_v27 = vmul.f32 %v409_v25, %v403_v30 }
 0x2fd   :  { %v414_v32 = vsel %vm405_vm3, %v400_v26, %v410_v20  ;;  %v415_v33 = vsel %vm406_vm4, %v401_v28, %v411_v23  ;;  %v416_v34 = vsel %vm407_vm5, %v402_v29, %v412_v31  ;;  %v417_v35 = vsel %vm408_vm6, %v403_v30, %v413_v27 }
 0x2fe   :  { %418 = vst [vmem:[#allocation6] sm:$0xff] %v414_v32  ;;  %419 = vst [vmem:[#allocation6 + $0x8] sm:$0xff] %v415_v33 }
 0x2ff   :  { %420 = vst [vmem:[#allocation6 + $0x10] sm:$0xff] %v416_v34  ;;  %421 = vst [vmem:[#allocation6 + $0x18] sm:$0xff] %v417_v35 }
 0x300   :  { %642 = shalt.err (!%p639_p12)
}
 0x301   :  { %s643_s24 = scalar_lea.hbm %s848_s7, 512 }
 0x302   :  { %p644_p13 = scmp.ne.s32.totalorder %s848_s7, %s643_s24  ;;  %p647_p0 = scmp.lt.u32.totalorder %s643_s24, %s848_s7 }
 0x304   :  { %p649_p1 = pnand %p647_p0, %p644_p13 }
 0x306   :  { %652 = shalt.err (!%p649_p1)
}
 0x307   :  { %433 = dma.vmem_to_hbm [thread:$0]  %s428_s21, 512, %s848_s7, [#allocation5], %s658_s11, %s658_s11, %s659_s12  }
 0x308   :  { %655 = dma.done.wait [#allocation5], 512  }
 0x309   :  { %656 = vsyncadd [#allocation5], 4294966784 }
 0x30a   :  { %437 = vsyncpa [#allocation4], 1 }
 0x30b   :  { %438 = vsyncpa [#allocation5], 1 }

</bundles_post_ra>
